<compile_context>
chip_gen: v7x
topology: tpu7x:2x2x1
jax: 0.10.0
libtpu: 0.0.40
codegen_flags: <defaults>
</compile_context>

<pallas_src>
import functools

import jax
import jax.numpy as jnp
from jax.experimental import pallas as pl
from jax.experimental.pallas import tpu as pltpu

LN_EPS = 1e-5


def adapter_kernel(x_ref, gamma_ref, beta_ref, wd_ref, bd_ref, wu_ref, bu_ref,
                   o_ref, *, scale, add_residual):
    # x_ref: (tm, D)   gamma/beta/bu: (1, D)   wd: (D, B)   bd: (1, B)   wu: (B, D)
    xf = x_ref[...].astype(jnp.float32)

    # LayerNorm over last dim (adapter_layernorm_option == 'in'), stats in f32.
    mean = jnp.mean(xf, axis=-1, keepdims=True)
    cent = xf - mean
    var = jnp.mean(cent * cent, axis=-1, keepdims=True)
    xn = cent * jax.lax.rsqrt(var + LN_EPS)
    xn = xn * gamma_ref[...].astype(jnp.float32) + beta_ref[...].astype(jnp.float32)
    # xf / cent are dead here: the residual is re-read from x_ref at the end so the
    # f32 copy does not stay live across both matmuls.

    # down_proj + ReLU: native-dtype MXU operands, f32 accumulation.
    down = jnp.dot(xn.astype(wd_ref.dtype), wd_ref[...],
                   preferred_element_type=jnp.float32)
    down = jnp.maximum(down + bd_ref[...].astype(jnp.float32), 0.0)

    # TODO(synk): dropout with p>0 in training mode not implemented (p=0.0 -> no-op).

    # up_proj, optional scale, optional residual add (residual == pre-LN x).
    up = jnp.dot(down.astype(wu_ref.dtype), wu_ref[...],
                 preferred_element_type=jnp.float32)
    up = up + bu_ref[...].astype(jnp.float32)
    if scale != 1.0:                  # static Python guard; no VPU mul when scale==1
        up = up * scale
    if add_residual:
        up = up + x_ref[...].astype(jnp.float32)   # residual re-read from the VMEM tile
    o_ref[...] = up.astype(o_ref.dtype)


def _round_up(a, b):
    return ((a + b - 1) // b) * b


def _hw_params():
    """Generation-aware knobs: (vmem_capacity_bytes, num_tensorcores, tile_bytes_target)."""
    vmem_cap = 128 << 20
    try:
        vmem_cap = int(getattr(pltpu.get_tpu_info(), "vmem_capacity_bytes", vmem_cap))
    except Exception:
        pass
    # v7x: 64 MiB VMEM per TensorCore, 2 TCs/chip, 3.2 TB/s HBM -> bigger byte target and
    # keep >=2 'parallel' steps so both TCs get work. v5e/v6e: 128 MiB VMEM, 1 TC.
    if vmem_cap <= (64 << 20):
        return vmem_cap, 2, 4 << 20
    return vmem_cap, 1, 2 << 20


def _choose_tiling(n_rows, D, Dd, x_itemsize, w_itemsize, sublane,
                   vmem_cap, num_tc, tile_bytes_target, requested_tm=None):
    """Row-tile size from a bytes-per-tile target, clamped to the work size and a
    VMEM budget; also returns the scoped-VMEM limit derived from the choice."""
    # VMEM cost model: double-buffered x/out row tiles, weights/biases (counted twice in
    # case the Buffered(1) request falls back to default double-buffering), and f32
    # intermediates xn/up (D each) + down (Dd) per row; residual is re-read, not live.
    const_bytes = 2 * D * Dd * w_itemsize + (3 * D + Dd) * 4
    per_row = 2 * 2 * D * x_itemsize + 4 * (2 * D + Dd)
    budget = int(0.70 * vmem_cap)

    if requested_tm is not None:
        tm = _round_up(max(int(requested_tm), 1), sublane)
    else:
        # Bytes-per-tile target: the streamed HBM bytes per row are ~2*D*itemsize (x + out).
        tm = max(sublane, (tile_bytes_target // (2 * D * x_itemsize)) // sublane * sublane)

    # Clamp to the VMEM budget.
    max_tm = max(sublane, ((budget - 2 * const_bytes) // per_row) // sublane * sublane)
    tm = min(tm, max_tm)

    # On 2-TC chips (v7x) keep >= num_tc balanced 'parallel' steps when there is enough
    # work; on single-TC v5e/v6e splitting one block only adds per-step overhead.
    if requested_tm is None and num_tc >= 2 and n_rows > num_tc * sublane:
        tm = min(tm, _round_up(pl.cdiv(n_rows, num_tc), sublane))

    # Never exceed the work: a single full-extent block is legal for any N (and avoids
    # any host-side padding for small / ragged token counts).
    if tm >= n_rows:
        tm = n_rows

    est = 2 * const_bytes + per_row * max(tm, sublane)
    vmem_limit = int(min(max(est + (2 << 20), 16 << 20), int(0.9 * vmem_cap)))
    return int(tm), vmem_limit


def adapter_forward(x, gamma, beta, w_down, b_down, w_up, b_up,
                    *, scale=1.0, add_residual=True, mxu_dtype=None, row_tile=None):
    """x: (B, T, D). Weights in (in, out) layout. Returns (B, T, D).

    Residual is the module default (residual = x); the kernel reuses the single x stream
    for the residual add. `mxu_dtype=jnp.bfloat16` optionally pre-casts the weights so f32
    inputs run native-rate MXU passes (mostly v5e headroom; changes numerics slightly).
    `row_tile` overrides the automatic byte-targeted tile size (testing only).
    """
    B, T, D = x.shape
    N = B * T
    Dd = w_down.shape[1]

    if mxu_dtype is not None:
        w_down = w_down.astype(mxu_dtype)
        w_up = w_up.astype(mxu_dtype)

    x_itemsize = jnp.dtype(x.dtype).itemsize
    w_itemsize = jnp.dtype(w_down.dtype).itemsize
    sublane = max(8, 32 // x_itemsize)    # 8 f32 / 16 bf16 / 32 int8

    vmem_cap, num_tc, tile_bytes_target = _hw_params()
    tm, vmem_limit = _choose_tiling(N, D, Dd, x_itemsize, w_itemsize, sublane,
                                    vmem_cap, num_tc, tile_bytes_target, row_tile)
    n_blocks = pl.cdiv(N, tm)

    # No host-side padding: Pallas masks the ragged last block's output rows, and the
    # garbage rows in the padded input region are row-local (LN + row-wise matmuls),
    # so they never contaminate valid rows.
    x2 = x.reshape(N, D)
    gamma2 = gamma.reshape(1, D)
    beta2 = beta.reshape(1, D)
    bd2 = b_down.reshape(1, Dd)
    bu2 = b_up.reshape(1, D)

    kernel = functools.partial(adapter_kernel, scale=float(scale),
                               add_residual=bool(add_residual))

    def build(single_buffer_consts):
        # Constant-index blocks are fetched once; Buffered(1) drops their second buffer.
        const_kw = dict(pipeline_mode=pl.Buffered(1)) if single_buffer_consts else {}
        row_spec = pl.BlockSpec((tm, D), lambda i: (i, 0))
        vecD_spec = pl.BlockSpec((1, D), lambda i: (0, 0), **const_kw)
        vecB_spec = pl.BlockSpec((1, Dd), lambda i: (0, 0), **const_kw)
        wd_spec = pl.BlockSpec((D, Dd), lambda i: (0, 0), **const_kw)
        wu_spec = pl.BlockSpec((Dd, D), lambda i: (0, 0), **const_kw)
        return pl.pallas_call(
            kernel,
            out_shape=jax.ShapeDtypeStruct((N, D), x.dtype),
            grid_spec=pltpu.PrefetchScalarGridSpec(
                num_scalar_prefetch=0,
                grid=(n_blocks,),
                in_specs=[row_spec, vecD_spec, vecD_spec,
                          wd_spec, vecB_spec, wu_spec, vecD_spec],
                out_specs=row_spec,
            ),
            compiler_params=pltpu.CompilerParams(
                dimension_semantics=("parallel",),
                vmem_limit_bytes=vmem_limit),
        )

    try:
        out = build(True)(x2, gamma2, beta2, w_down, bd2, w_up, bu2)
    except Exception:
        # Fallback for JAX versions that reject pipeline_mode=pl.Buffered(1).
        out = build(False)(x2, gamma2, beta2, w_down, bd2, w_up, bu2)

    return out.reshape(B, T, D)


def adapter_reference(x, gamma, beta, w_down, b_down, w_up, b_up, scale=1.0):
    xf = x.astype(jnp.float32)
    mean = jnp.mean(xf, axis=-1, keepdims=True)
    var = jnp.mean((xf - mean) ** 2, axis=-1, keepdims=True)
    xn = (xf - mean) * jax.lax.rsqrt(var + LN_EPS) * gamma + beta
    down = jnp.maximum(xn @ w_down.astype(jnp.float32) + b_down, 0.0)
    up = (down @ w_up.astype(jnp.float32) + b_up) * scale
    return (up + xf).astype(x.dtype)


if __name__ == "__main__":
    # Small shapes consistent with the module: batch=2, seq=8, n_embd=128, bottleneck=32
    # (n_embd a multiple of 128 so output stores are lane-dense).
    B, T, D, Dd = 2, 8, 128, 32
    key = jax.random.PRNGKey(0)
    kx, kg, kb, kwd, kbd, kwu, kbu = jax.random.split(key, 7)

    x = jax.random.normal(kx, (B, T, D), dtype=jnp.float32)

    # Deterministic synthetic parameters (LayerNorm affine + two Linear layers stored
    # pre-transposed as (in, out)). Non-zero up_proj so the kernel path matters.
    gamma = 1.0 + 0.1 * jax.random.normal(kg, (D,), dtype=jnp.float32)
    beta = 0.1 * jax.random.normal(kb, (D,), dtype=jnp.float32)
    w_down = jax.random.normal(kwd, (D, Dd), dtype=jnp.float32) / jnp.sqrt(D)
    b_down = 0.05 * jax.random.normal(kbd, (Dd,), dtype=jnp.float32)
    w_up = jax.random.normal(kwu, (Dd, D), dtype=jnp.float32) / jnp.sqrt(Dd)
    b_up = 0.05 * jax.random.normal(kbu, (D,), dtype=jnp.float32)

    out = adapter_forward(x, gamma, beta, w_down, b_down, w_up, b_up,
                          scale=1.0, add_residual=True)
    out = jax.block_until_ready(out)

    ref = adapter_reference(x, gamma, beta, w_down, b_down, w_up, b_up, scale=1.0)
    # Tolerance covers the MXU's internal bf16-pass f32 matmul decomposition.
    assert jnp.allclose(out, ref, atol=1e-2, rtol=1e-2), "mismatch vs reference"

    # Ragged token count (N = 15, not a multiple of the 8-row tile): exercises the
    # in-kernel boundary-block masking that replaced the host-side pad/slice passes.
    Br, Tr = 3, 5
    xr = jax.random.normal(kx, (Br, Tr, D), dtype=jnp.float32)
    out_r = adapter_forward(xr, gamma, beta, w_down, b_down, w_up, b_up,
                            scale=1.0, add_residual=True, row_tile=8)
    out_r = jax.block_until_ready(out_r)
    ref_r = adapter_reference(xr, gamma, beta, w_down, b_down, w_up, b_up, scale=1.0)
    assert jnp.allclose(out_r, ref_r, atol=1e-2, rtol=1e-2), "ragged mismatch vs reference"

    print("KERNEL_OK")
</pallas_src>

<mosaic_0001>
module attributes {stable_mosaic.version = 11 : i64} {
  func.func @adapter_kernel(%arg0: i32, %arg1: memref<16x128xf32, #tpu.memory_space<vmem>>, %arg2: memref<1x128xf32, #tpu.memory_space<vmem>>, %arg3: memref<1x128xf32, #tpu.memory_space<vmem>>, %arg4: memref<128x32xf32, #tpu.memory_space<vmem>>, %arg5: memref<1x32xf32, #tpu.memory_space<vmem>>, %arg6: memref<32x128xf32, #tpu.memory_space<vmem>>, %arg7: memref<1x128xf32, #tpu.memory_space<vmem>>, %arg8: memref<16x128xf32, #tpu.memory_space<vmem>>) attributes {dimension_semantics = [#tpu.dimension_semantics<parallel>], iteration_bounds = array<i64: 1>, scalar_prefetch = 0 : i64, scratch_operands = 0 : i64, tpu.core_type = #tpu.core_type<tc>, window_params = [{transform_indices = @transform_0, window_bounds = array<i64: 16, 128>}, {pipeline_mode = #tpu.pipeline_mode<synchronous>, transform_indices = @transform_1, window_bounds = array<i64: 1, 128>}, {pipeline_mode = #tpu.pipeline_mode<synchronous>, transform_indices = @transform_2, window_bounds = array<i64: 1, 128>}, {pipeline_mode = #tpu.pipeline_mode<synchronous>, transform_indices = @transform_3, window_bounds = array<i64: 128, 32>}, {pipeline_mode = #tpu.pipeline_mode<synchronous>, transform_indices = @transform_4, window_bounds = array<i64: 1, 32>}, {pipeline_mode = #tpu.pipeline_mode<synchronous>, transform_indices = @transform_5, window_bounds = array<i64: 32, 128>}, {pipeline_mode = #tpu.pipeline_mode<synchronous>, transform_indices = @transform_6, window_bounds = array<i64: 1, 128>}, {transform_indices = @transform_7, window_bounds = array<i64: 16, 128>}]} {
    %c0 = arith.constant 0 : index
    %c0_0 = arith.constant 0 : index
    %0 = vector.load %arg1[%c0, %c0_0] : memref<16x128xf32, #tpu.memory_space<vmem>>, vector<16x128xf32>
    %cst = arith.constant dense<0.000000e+00> : vector<16xf32>
    %1 = vector.multi_reduction <add>, %0, %cst [1] : vector<16x128xf32> to vector<16xf32>
    %2 = vector.shape_cast %1 : vector<16xf32> to vector<16x1xf32>
    %cst_1 = arith.constant 1.280000e+02 : f32
    %3 = vector.broadcast %cst_1 : f32 to vector<16x1xf32>
    %4 = arith.divf %2, %3 : vector<16x1xf32>
    %5 = vector.broadcast %4 : vector<16x1xf32> to vector<16x128xf32>
    %6 = arith.subf %0, %5 : vector<16x128xf32>
    %7 = arith.mulf %6, %6 : vector<16x128xf32>
    %cst_2 = arith.constant dense<0.000000e+00> : vector<16xf32>
    %8 = vector.multi_reduction <add>, %7, %cst_2 [1] : vector<16x128xf32> to vector<16xf32>
    %9 = vector.shape_cast %8 : vector<16xf32> to vector<16x1xf32>
    %cst_3 = arith.constant 1.280000e+02 : f32
    %10 = vector.broadcast %cst_3 : f32 to vector<16x1xf32>
    %11 = arith.divf %9, %10 : vector<16x1xf32>
    %cst_4 = arith.constant 9.99999974E-6 : f32
    %12 = vector.broadcast %cst_4 : f32 to vector<16x1xf32>
    %13 = arith.addf %11, %12 : vector<16x1xf32>
    %14 = math.rsqrt %13 : vector<16x1xf32>
    %15 = vector.broadcast %14 : vector<16x1xf32> to vector<16x128xf32>
    %16 = arith.mulf %6, %15 : vector<16x128xf32>
    %c0_5 = arith.constant 0 : index
    %c0_6 = arith.constant 0 : index
    %17 = vector.load %arg2[%c0_5, %c0_6] : memref<1x128xf32, #tpu.memory_space<vmem>>, vector<1x128xf32>
    %18 = vector.broadcast %17 : vector<1x128xf32> to vector<16x128xf32>
    %19 = arith.mulf %16, %18 : vector<16x128xf32>
    %c0_7 = arith.constant 0 : index
    %c0_8 = arith.constant 0 : index
    %20 = vector.load %arg3[%c0_7, %c0_8] : memref<1x128xf32, #tpu.memory_space<vmem>>, vector<1x128xf32>
    %21 = vector.broadcast %20 : vector<1x128xf32> to vector<16x128xf32>
    %22 = arith.addf %19, %21 : vector<16x128xf32>
    %c0_9 = arith.constant 0 : index
    %c0_10 = arith.constant 0 : index
    %23 = vector.load %arg4[%c0_9, %c0_10] : memref<128x32xf32, #tpu.memory_space<vmem>>, vector<128x32xf32>
    %cst_11 = arith.constant dense<0.000000e+00> : vector<16x32xf32>
    %24 = tpu.matmul %22, %23, %cst_11 {dimension_numbers = #tpu.dot_dimension_numbers<[1], [0], [0], [1], [0, 0, 1, 1], [], []>} : vector<16x128xf32>, vector<128x32xf32>, vector<16x32xf32> -> vector<16x32xf32>
    %c0_12 = arith.constant 0 : index
    %c0_13 = arith.constant 0 : index
    %25 = vector.load %arg5[%c0_12, %c0_13] : memref<1x32xf32, #tpu.memory_space<vmem>>, vector<1x32xf32>
    %26 = vector.broadcast %25 : vector<1x32xf32> to vector<16x32xf32>
    %27 = arith.addf %24, %26 : vector<16x32xf32>
    %cst_14 = arith.constant 0.000000e+00 : f32
    %28 = vector.broadcast %cst_14 : f32 to vector<16x32xf32>
    %29 = arith.maximumf %27, %28 : vector<16x32xf32>
    %c0_15 = arith.constant 0 : index
    %c0_16 = arith.constant 0 : index
    %30 = vector.load %arg6[%c0_15, %c0_16] : memref<32x128xf32, #tpu.memory_space<vmem>>, vector<32x128xf32>
    %cst_17 = arith.constant dense<0.000000e+00> : vector<16x128xf32>
    %31 = tpu.matmul %29, %30, %cst_17 {dimension_numbers = #tpu.dot_dimension_numbers<[1], [0], [0], [1], [0, 0, 1, 1], [], []>} : vector<16x32xf32>, vector<32x128xf32>, vector<16x128xf32> -> vector<16x128xf32>
    %c0_18 = arith.constant 0 : index
    %c0_19 = arith.constant 0 : index
    %32 = vector.load %arg7[%c0_18, %c0_19] : memref<1x128xf32, #tpu.memory_space<vmem>>, vector<1x128xf32>
    %33 = vector.broadcast %32 : vector<1x128xf32> to vector<16x128xf32>
    %34 = arith.addf %31, %33 : vector<16x128xf32>
    %c0_20 = arith.constant 0 : index
    %c0_21 = arith.constant 0 : index
    %35 = vector.load %arg1[%c0_20, %c0_21] : memref<16x128xf32, #tpu.memory_space<vmem>>, vector<16x128xf32>
    %36 = arith.addf %34, %35 : vector<16x128xf32>
    %c0_22 = arith.constant 0 : index
    %c0_23 = arith.constant 0 : index
    %37 = vector.load %arg8[%c0_22, %c0_23] : memref<16x128xf32, #tpu.memory_space<vmem>>, vector<16x128xf32>
    tpu.vector_store %arg8[%c0_22, %c0_23], %36 {strides = array<i32>} : memref<16x128xf32, #tpu.memory_space<vmem>>, vector<16x128xf32>,
    return
  }
  func.func @transform_0(%arg0: i32) -> (i32, i32) {
    %c0_i32 = arith.constant 0 : i32
    %c0_i32_0 = arith.constant 0 : i32
    return %arg0, %c0_i32 : i32, i32
  }
  func.func @transform_1(%arg0: i32) -> (i32, i32) {
    %c0_i32 = arith.constant 0 : i32
    %c0_i32_0 = arith.constant 0 : i32
    %c0_i32_1 = arith.constant 0 : i32
    return %c0_i32, %c0_i32_0 : i32, i32
  }
  func.func @transform_2(%arg0: i32) -> (i32, i32) {
    %c0_i32 = arith.constant 0 : i32
    %c0_i32_0 = arith.constant 0 : i32
    %c0_i32_1 = arith.constant 0 : i32
    return %c0_i32, %c0_i32_0 : i32, i32
  }
  func.func @transform_3(%arg0: i32) -> (i32, i32) {
    %c0_i32 = arith.constant 0 : i32
    %c0_i32_0 = arith.constant 0 : i32
    %c0_i32_1 = arith.constant 0 : i32
    return %c0_i32, %c0_i32_0 : i32, i32
  }
  func.func @transform_4(%arg0: i32) -> (i32, i32) {
    %c0_i32 = arith.constant 0 : i32
    %c0_i32_0 = arith.constant 0 : i32
    %c0_i32_1 = arith.constant 0 : i32
    return %c0_i32, %c0_i32_0 : i32, i32
  }
  func.func @transform_5(%arg0: i32) -> (i32, i32) {
    %c0_i32 = arith.constant 0 : i32
    %c0_i32_0 = arith.constant 0 : i32
    %c0_i32_1 = arith.constant 0 : i32
    return %c0_i32, %c0_i32_0 : i32, i32
  }
  func.func @transform_6(%arg0: i32) -> (i32, i32) {
    %c0_i32 = arith.constant 0 : i32
    %c0_i32_0 = arith.constant 0 : i32
    %c0_i32_1 = arith.constant 0 : i32
    return %c0_i32, %c0_i32_0 : i32, i32
  }
  func.func @transform_7(%arg0: i32) -> (i32, i32) {
    %c0_i32 = arith.constant 0 : i32
    %c0_i32_0 = arith.constant 0 : i32
    return %arg0, %c0_i32 : i32, i32
  }
}

module attributes {stable_mosaic.version = 11 : i64} {
  func.func @adapter_kernel(%arg0: i32, %arg1: memref<16x128xf32, #tpu.memory_space<vmem>>, %arg2: memref<1x128xf32, #tpu.memory_space<vmem>>, %arg3: memref<1x128xf32, #tpu.memory_space<vmem>>, %arg4: memref<128x32xf32, #tpu.memory_space<vmem>>, %arg5: memref<1x32xf32, #tpu.memory_space<vmem>>, %arg6: memref<32x128xf32, #tpu.memory_space<vmem>>, %arg7: memref<1x128xf32, #tpu.memory_space<vmem>>, %arg8: memref<16x128xf32, #tpu.memory_space<vmem>>) attributes {dimension_semantics = [#tpu.dimension_semantics<parallel>], iteration_bounds = array<i64: 1>, scalar_prefetch = 0 : i64, scratch_operands = 0 : i64, tpu.core_type = #tpu.core_type<tc>, window_params = [{transform_indices = @transform_0, window_bounds = array<i64: 16, 128>}, {pipeline_mode = #tpu.pipeline_mode<synchronous>, transform_indices = @transform_1, window_bounds = array<i64: 1, 128>}, {pipeline_mode = #tpu.pipeline_mode<synchronous>, transform_indices = @transform_2, window_bounds = array<i64: 1, 128>}, {pipeline_mode = #tpu.pipeline_mode<synchronous>, transform_indices = @transform_3, window_bounds = array<i64: 128, 32>}, {pipeline_mode = #tpu.pipeline_mode<synchronous>, transform_indices = @transform_4, window_bounds = array<i64: 1, 32>}, {pipeline_mode = #tpu.pipeline_mode<synchronous>, transform_indices = @transform_5, window_bounds = array<i64: 32, 128>}, {pipeline_mode = #tpu.pipeline_mode<synchronous>, transform_indices = @transform_6, window_bounds = array<i64: 1, 128>}, {transform_indices = @transform_7, window_bounds = array<i64: 16, 128>}]} {
    %c0 = arith.constant 0 : index
    %c0_0 = arith.constant 0 : index
    %0 = vector.load %arg1[%c0, %c0_0] : memref<16x128xf32, #tpu.memory_space<vmem>>, vector<16x128xf32>
    %cst = arith.constant dense<0.000000e+00> : vector<16xf32>
    %1 = vector.multi_reduction <add>, %0, %cst [1] : vector<16x128xf32> to vector<16xf32>
    %2 = vector.shape_cast %1 : vector<16xf32> to vector<16x1xf32>
    %cst_1 = arith.constant 1.280000e+02 : f32
    %3 = vector.broadcast %cst_1 : f32 to vector<16x1xf32>
    %4 = arith.divf %2, %3 : vector<16x1xf32>
    %5 = vector.broadcast %4 : vector<16x1xf32> to vector<16x128xf32>
    %6 = arith.subf %0, %5 : vector<16x128xf32>
    %7 = arith.mulf %6, %6 : vector<16x128xf32>
    %cst_2 = arith.constant dense<0.000000e+00> : vector<16xf32>
    %8 = vector.multi_reduction <add>, %7, %cst_2 [1] : vector<16x128xf32> to vector<16xf32>
    %9 = vector.shape_cast %8 : vector<16xf32> to vector<16x1xf32>
    %cst_3 = arith.constant 1.280000e+02 : f32
    %10 = vector.broadcast %cst_3 : f32 to vector<16x1xf32>
    %11 = arith.divf %9, %10 : vector<16x1xf32>
    %cst_4 = arith.constant 9.99999974E-6 : f32
    %12 = vector.broadcast %cst_4 : f32 to vector<16x1xf32>
    %13 = arith.addf %11, %12 : vector<16x1xf32>
    %14 = math.rsqrt %13 : vector<16x1xf32>
    %15 = vector.broadcast %14 : vector<16x1xf32> to vector<16x128xf32>
    %16 = arith.mulf %6, %15 : vector<16x128xf32>
    %c0_5 = arith.constant 0 : index
    %c0_6 = arith.constant 0 : index
    %17 = vector.load %arg2[%c0_5, %c0_6] : memref<1x128xf32, #tpu.memory_space<vmem>>, vector<1x128xf32>
    %18 = vector.broadcast %17 : vector<1x128xf32> to vector<16x128xf32>
    %19 = arith.mulf %16, %18 : vector<16x128xf32>
    %c0_7 = arith.constant 0 : index
    %c0_8 = arith.constant 0 : index
    %20 = vector.load %arg3[%c0_7, %c0_8] : memref<1x128xf32, #tpu.memory_space<vmem>>, vector<1x128xf32>
    %21 = vector.broadcast %20 : vector<1x128xf32> to vector<16x128xf32>
    %22 = arith.addf %19, %21 : vector<16x128xf32>
    %c0_9 = arith.constant 0 : index
    %c0_10 = arith.constant 0 : index
    %23 = vector.load %arg4[%c0_9, %c0_10] : memref<128x32xf32, #tpu.memory_space<vmem>>, vector<128x32xf32>
    %cst_11 = arith.constant dense<0.000000e+00> : vector<16x32xf32>
    %24 = tpu.matmul %22, %23, %cst_11 {dimension_numbers = #tpu.dot_dimension_numbers<[1], [0], [0], [1], [0, 0, 1, 1], [], []>} : vector<16x128xf32>, vector<128x32xf32>, vector<16x32xf32> -> vector<16x32xf32>
    %c0_12 = arith.constant 0 : index
    %c0_13 = arith.constant 0 : index
    %25 = vector.load %arg5[%c0_12, %c0_13] : memref<1x32xf32, #tpu.memory_space<vmem>>, vector<1x32xf32>
    %26 = vector.broadcast %25 : vector<1x32xf32> to vector<16x32xf32>
    %27 = arith.addf %24, %26 : vector<16x32xf32>
    %cst_14 = arith.constant 0.000000e+00 : f32
    %28 = vector.broadcast %cst_14 : f32 to vector<16x32xf32>
    %29 = arith.maximumf %27, %28 : vector<16x32xf32>
    %c0_15 = arith.constant 0 : index
    %c0_16 = arith.constant 0 : index
    %30 = vector.load %arg6[%c0_15, %c0_16] : memref<32x128xf32, #tpu.memory_space<vmem>>, vector<32x128xf32>
    %cst_17 = arith.constant dense<0.000000e+00> : vector<16x128xf32>
    %31 = tpu.matmul %29, %30, %cst_17 {dimension_numbers = #tpu.dot_dimension_numbers<[1], [0], [0], [1], [0, 0, 1, 1], [], []>} : vector<16x32xf32>, vector<32x128xf32>, vector<16x128xf32> -> vector<16x128xf32>
    %c0_18 = arith.constant 0 : index
    %c0_19 = arith.constant 0 : index
    %32 = vector.load %arg7[%c0_18, %c0_19] : memref<1x128xf32, #tpu.memory_space<vmem>>, vector<1x128xf32>
    %33 = vector.broadcast %32 : vector<1x128xf32> to vector<16x128xf32>
    %34 = arith.addf %31, %33 : vector<16x128xf32>
    %c0_20 = arith.constant 0 : index
    %c0_21 = arith.constant 0 : index
    %35 = vector.load %arg1[%c0_20, %c0_21] : memref<16x128xf32, #tpu.memory_space<vmem>>, vector<16x128xf32>
    %36 = arith.addf %34, %35 : vector<16x128xf32>
    %c0_22 = arith.constant 0 : index
    %c0_23 = arith.constant 0 : index
    %37 = vector.load %arg8[%c0_22, %c0_23] : memref<16x128xf32, #tpu.memory_space<vmem>>, vector<16x128xf32>
    tpu.vector_store %arg8[%c0_22, %c0_23], %36 {strides = array<i32>} : memref<16x128xf32, #tpu.memory_space<vmem>>, vector<16x128xf32>,
    return
  }
  func.func @transform_0(%arg0: i32) -> (i32, i32) {
    %c0_i32 = arith.constant 0 : i32
    %c0_i32_0 = arith.constant 0 : i32
    return %arg0, %c0_i32 : i32, i32
  }
  func.func @transform_1(%arg0: i32) -> (i32, i32) {
    %c0_i32 = arith.constant 0 : i32
    %c0_i32_0 = arith.constant 0 : i32
    %c0_i32_1 = arith.constant 0 : i32
    return %c0_i32, %c0_i32_0 : i32, i32
  }
  func.func @transform_2(%arg0: i32) -> (i32, i32) {
    %c0_i32 = arith.constant 0 : i32
    %c0_i32_0 = arith.constant 0 : i32
    %c0_i32_1 = arith.constant 0 : i32
    return %c0_i32, %c0_i32_0 : i32, i32
  }
  func.func @transform_3(%arg0: i32) -> (i32, i32) {
    %c0_i32 = arith.constant 0 : i32
    %c0_i32_0 = arith.constant 0 : i32
    %c0_i32_1 = arith.constant 0 : i32
    return %c0_i32, %c0_i32_0 : i32, i32
  }
  func.func @transform_4(%arg0: i32) -> (i32, i32) {
    %c0_i32 = arith.constant 0 : i32
    %c0_i32_0 = arith.constant 0 : i32
    %c0_i32_1 = arith.constant 0 : i32
    return %c0_i32, %c0_i32_0 : i32, i32
  }
  func.func @transform_5(%arg0: i32) -> (i32, i32) {
    %c0_i32 = arith.constant 0 : i32
    %c0_i32_0 = arith.constant 0 : i32
    %c0_i32_1 = arith.constant 0 : i32
    return %c0_i32, %c0_i32_0 : i32, i32
  }
  func.func @transform_6(%arg0: i32) -> (i32, i32) {
    %c0_i32 = arith.constant 0 : i32
    %c0_i32_0 = arith.constant 0 : i32
    %c0_i32_1 = arith.constant 0 : i32
    return %c0_i32, %c0_i32_0 : i32, i32
  }
  func.func @transform_7(%arg0: i32) -> (i32, i32) {
    %c0_i32 = arith.constant 0 : i32
    %c0_i32_0 = arith.constant 0 : i32
    return %arg0, %c0_i32 : i32, i32
  }
}

</mosaic_0001>

<bundles_post_ra>
// kernel: tpu_custom_call.1
= control target key start
LH: loop header
LB: loop body
LE: loop exit
PB: predicated region body
PF: predicated region fallthrough
CT: control target
= control target key end

     0   :  { %s573_s0 = inlined_call_operand.vmem [shape: f32[16,128], index: 0, kind: input, shape index: {}]   ;;  %s574_s1 = inlined_call_operand.vmem [shape: f32[1,128], index: 1, kind: input, shape index: {}]   ;;  %s575_s2 = inlined_call_operand.vmem [shape: f32[1,128], index: 2, kind: input, shape index: {}]   ;;  %s576_s3 = inlined_call_operand.vmem [shape: f32[128,32], index: 3, kind: input, shape index: {}]   ;;  %s577_s4 = inlined_call_operand.vmem [shape: f32[1,32], index: 4, kind: input, shape index: {}]   ;;  %s578_s5 = inlined_call_operand.vmem [shape: f32[32,128], index: 5, kind: input, shape index: {}]   ;;  %s579_s6 = inlined_call_operand.vmem [shape: f32[1,128], index: 6, kind: input, shape index: {}]   ;;  %s580_s7 = inlined_call_operand.hbm [shape: f32[16,128], index: 7, kind: output, shape index: {}]  }
   0x1   :  { %v476_v0 = vld [vmem:[%s573_s0] sm:$0xff] }
   0x2   :  { %12 = vsyncpa [#allocation3], 0  ;;  %29 = vadd.xlane.f32.xlu0 %v476_v0  ;;  %v482_v1 = vld [vmem:[%s573_s0 + $0x8] sm:$0xff]  ;;  %v70_v2 = vld [vmem:[%s576_s3] sm:$0xff]  ;;  %vm181_vm0 = vcmask 261120  }
   0x3   :  { %v71_v3 = vld [vmem:[%s576_s3 + $0x8] sm:$0xff]  ;;  %v72_v4 = vld [vmem:[%s576_s3 + $0x10] sm:$0xff]  ;;  %v73_v6 = vld [vmem:[%s576_s3 + $0x18] sm:$0xff] }
   0x4   :  { %v359_v5 = vpack.c.bf16 %v71_v3, %v70_v2  ;;  %v363_v7 = vpack.c.bf16 %v73_v6, %v72_v4  ;;  %v74_v16 = vld [vmem:[%s576_s3 + $0x20] sm:$0xff]  ;;  %v75_v17 = vld [vmem:[%s576_s3 + $0x28] sm:$0xff]  ;;  %v76_v19 = vld [vmem:[%s576_s3 + $0x30] sm:$0xff] }
   0x5   :  { %v367_v18 = vpack.c.bf16 %v75_v17, %v74_v16  ;;  %v77_v20 = vld [vmem:[%s576_s3 + $0x38] sm:$0xff]  ;;  %v78_v22 = vld [vmem:[%s576_s3 + $0x40] sm:$0xff]  ;;  %v79_v23 = vld [vmem:[%s576_s3 + $0x48] sm:$0xff] }
   0x6   :  { %31 = vadd.xlane.f32.xlu0 %v482_v1  ;;  %360 = vmatprep.subr.bf16.mxu0 %v359_v5  ;;  %v371_v21 = vpack.c.bf16 %v77_v20, %v76_v19  ;;  %v375_v24 = vpack.c.bf16 %v79_v23, %v78_v22  ;;  %v80_v25 = vld [vmem:[%s576_s3 + $0x50] sm:$0xff]  ;;  %v81_v26 = vld [vmem:[%s576_s3 + $0x58] sm:$0xff]  ;;  %v82_v27 = vld [vmem:[%s576_s3 + $0x60] sm:$0xff] }
   0x7   :  { %362 = vmatpush3.bf16.msra.mxu0 %v359_v5  ;;  %v379_v28 = vpack.c.bf16 %v81_v26, %v80_v25  ;;  %v83_v29 = vld [vmem:[%s576_s3 + $0x68] sm:$0xff]  ;;  %v84_v31 = vld [vmem:[%s576_s3 + $0x70] sm:$0xff]  ;;  %v85_v32 = vld [vmem:[%s576_s3 + $0x78] sm:$0xff] }
   0x8   :  { %364 = vmatprep.subr.bf16.mxu0 %v363_v7  ;;  %v383_v30 = vpack.c.bf16 %v83_v29, %v82_v27  ;;  %v387_v33 = vpack.c.bf16 %v85_v32, %v84_v31  ;;  %v170_v34 = vld [vmem:[%s578_s5] sm:$0xff]  ;;  %v171_v35 = vld [vmem:[%s578_s5 + $0x8] sm:$0xff]  ;;  %v172_v53 = vld [vmem:[%s578_s5 + $0x10] sm:$0xff] }
   0x9   :  { %v391_v36 = vpack.c.bf16 %v171_v35, %v170_v34  ;;  %v283_v44 = vld [vmem:[%s574_s1] ss:$0 sm:$0xff]  ;;  %v173_v54 = vld [vmem:[%s578_s5 + $0x18] sm:$0xff]  ;;  %s430_s5 = smov [#allocation2]  }
   0xa   :  { %v284_v46 = vld [vmem:[%s575_s2] ss:$0 sm:$0xff]  ;;  %v395_v55 = vpack.c.bf16 %v173_v54, %v172_v53  ;;  %s272_s25 = sshll.u32 %s430_s5, 4  ;;  %s273_s25 = int_to_ptr.vmem [resolvable:$true] %s272_s25 }
   0xb   :  { %366 = vmatpush3.bf16.msra.mxu0 %v363_v7  ;;  %392 = vmatprep.subr.bf16.mxu1 %v391_v36  ;;  %v285_v56 = vld [vmem:[%s577_s4] ss:$0 sm:$0xff]  ;;  %s406_s4 = scalar_lea.vmem %s273_s25, 256  ;;  %p411_p1 = scmp.lt.s32.totalorder %s273_s25, %s273_s25 }
   0xc   :  { %368 = vmatprep.subr.bf16.mxu0 %v367_v18  ;;  %394 = vmatpush3.bf16.msra.mxu1 %v391_v36  ;;  %v286_v63 = vld [vmem:[%s579_s6] ss:$0 sm:$0xff]  ;;  %p407_p0 = scmp.ne.s32.totalorder %s273_s25, %s406_s4  ;;  %p412_p2 = scmp.lt.s32.totalorder %s406_s4, %s406_s4 }
   0xd   :  { %396 = vmatprep.subr.bf16.mxu1 %v395_v55 }
   0xe   :  { %p413_p3 = por %p412_p2, %p411_p1 }
   0xf   :  { %370 = vmatpush3.bf16.msra.mxu0 %v367_v18 }
  0x10   :  { %372 = vmatprep.subr.bf16.mxu0 %v371_v21  ;;  %398 = vmatpush3.bf16.msra.mxu1 %v395_v55  ;;  %p414_p4 = pnand %p413_p3, %p407_p0 }
  0x13   :  { %374 = vmatpush3.bf16.msra.mxu0 %v371_v21 }
  0x14   :  { %376 = vmatprep.subr.bf16.mxu0 %v375_v24 }
  0x17   :  { %378 = vmatpush3.bf16.msra.mxu0 %v375_v24 }
  0x18   :  { %380 = vmatprep.subr.bf16.mxu0 %v379_v28 }
  0x1b   :  { %382 = vmatpush3.bf16.msra.mxu0 %v379_v28 }
  0x1c   :  { %384 = vmatprep.subr.bf16.mxu0 %v383_v30 }
  0x1f   :  { %386 = vmatpush3.bf16.msra.mxu0 %v383_v30 }
  0x20   :  { %388 = vmatprep.subr.bf16.mxu0 %v387_v33 }
  0x23   :  { %390 = vmatpush3.bf16.msra.mxu0 %v387_v33 }
  0x8f   :  { %v30_v8 = vpop.xlane.xlu0 %29 }
  0x90   :  { %v34_v9 = vmul.f32 0.0078125, %v30_v8 }
  0x92   :  { %v36_v10 = vsub.f32 %v476_v0, %v34_v9 }
  0x93   :  { %v32_v11 = vpop.xlane.xlu0 %31 }
  0x94   :  { %v35_v12 = vmul.f32 0.0078125, %v32_v11  ;;  %v38_v13 = vmul.f32 %v36_v10, %v36_v10 }
  0x96   :  { %v37_v14 = vsub.f32 %v482_v1, %v35_v12  ;;  %40 = vadd.xlane.f32.xlu1 %v38_v13 }
  0x98   :  { %v39_v15 = vmul.f32 %v37_v14, %v37_v14 }
  0x9a   :  { %42 = vadd.xlane.f32.xlu1 %v39_v15 }
 0x123   :  { %v41_v37 = vpop.xlane.xlu1 %40 }
 0x124   :  { %v44_v38 = vmul.f32 0.0078125, %v41_v37 }
 0x126   :  { %v46_v39 = vadd.f32 1e-05, %v44_v38 }
 0x127   :  { %v43_v40 = vpop.xlane.xlu1 %42 }
 0x128   :  { %402 = vrsqrt.f32 %v46_v39  ;;  %v45_v41 = vmul.f32 0.0078125, %v43_v40 }
 0x12a   :  { %v47_v42 = vadd.f32 1e-05, %v45_v41 }
 0x12c   :  { %404 = vrsqrt.f32 %v47_v42 }
 0x132   :  { %v403_v43 = vpop.eup %402 }
 0x133   :  { %v50_v45 = vmul.f32 %v403_v43, %v36_v10 }
 0x135   :  { %v59_v47 = vmul.f32 %v283_v44, %v50_v45 }
 0x136   :  { %v405_v48 = vpop.eup %404 }
 0x137   :  { %v51_v49 = vmul.f32 %v405_v48, %v37_v14  ;;  %v68_v50 = vadd.f32 %v284_v46, %v59_v47 }
 0x139   :  { %v60_v51 = vmul.f32 %v283_v44, %v51_v49  ;;  %345 = vmatprep.mubr.f32.mxu0 %v68_v50 }
 0x13b   :  { %v69_v52 = vadd.f32 %v284_v46, %v60_v51 }
 0x13d   :  { %346 = vmatmul.mubr.f32.vlgmr.msra.gmra.mrb[0].mxu0 %v69_v52 }
 0x210   :  { %v347_v57 = vpop.f32.mrb[0].mxu0 }
 0x211   :  { %v165_v58 = vadd.f32 %v347_v57, %v285_v56  ;;  %v159_v59 = vpop.f32.mrb[1].mxu0 }
 0x212   :  { %v160_v60 = vadd.f32 %v285_v56, %v159_v59 }
 0x213   :  { %v169_v62 = vmax.f32 %v165_v58, 0.0 }
 0x214   :  { %v168_v61 = vmax.f32 %v160_v60, 0.0 }
 0x216   :  { %356 = vmatprep.mubr.msk.f32.mxu1 %vm181_vm0, %v168_v61 }
 0x217   :  { %357 = vmatmul.mubr.msk.f32.vlgmr.msra.gmra.mrb[0].mxu1 %vm181_vm0, %v169_v62 }
 0x2ea   :  { %v358_v2 = vpop.f32.mrb[0].mxu1 }
 0x2eb   :  { %v260_v3 = vadd.f32 %v358_v2, %v286_v63  ;;  %v254_v4 = vpop.f32.mrb[1].mxu1 }
 0x2ec   :  { %v255_v5 = vadd.f32 %v286_v63, %v254_v4 }
 0x2ed   :  { %v264_v6 = vadd.f32 %v260_v3, %v482_v1 }
 0x2ee   :  { %v263_v7 = vadd.f32 %v255_v5, %v476_v0 }
 0x2ef   :  { %266 = vst [vmem:[#allocation2 + $0x8] sm:$0xff] %v264_v6 }
 0x2f0   :  { %265 = vst [vmem:[#allocation2] sm:$0xff] %v263_v7 }
 0x2f1   :  { %417 = shalt.err (!%p414_p4)
}
 0x2f2   :  { %s418_s27 = scalar_lea.hbm %s580_s7, 256 }
 0x2f3   :  { %p419_p5 = scmp.ne.s32.totalorder %s580_s7, %s418_s27  ;;  %p422_p6 = scmp.lt.u32.totalorder %s418_s27, %s580_s7 }
 0x2f5   :  { %p424_p7 = pnand %p422_p6, %p419_p5 }
 0x2f7   :  { %427 = shalt.err (!%p424_p7)
}
 0x2f8   :  { %s431_s9 = smov 128   ;;  %s432_s10 = smov 8  }
 0x2f9   :  { %278 = dma.vmem_to_hbm [thread:$0]  %s273_s25, 256, %s580_s7, [#allocation3], %s431_s9, %s431_s9, %s432_s10  }
 0x2fa   :  { %428 = dma.done.wait [#allocation3], 256  }
 0x2fb   :  { %429 = vsyncadd [#allocation3], 4294967040 }
 0x2fc   :  { %282 = vsyncpa [#allocation3], 1 }

// kernel: tpu_custom_call.1
= control target key start
LH: loop header
LB: loop body
LE: loop exit
PB: predicated region body
PF: predicated region fallthrough
CT: control target
= control target key end

     0   :  { %s573_s0 = inlined_call_operand.vmem [shape: f32[16,128], index: 0, kind: input, shape index: {}]   ;;  %s574_s1 = inlined_call_operand.vmem [shape: f32[1,128], index: 1, kind: input, shape index: {}]   ;;  %s575_s2 = inlined_call_operand.vmem [shape: f32[1,128], index: 2, kind: input, shape index: {}]   ;;  %s576_s3 = inlined_call_operand.vmem [shape: f32[128,32], index: 3, kind: input, shape index: {}]   ;;  %s577_s4 = inlined_call_operand.vmem [shape: f32[1,32], index: 4, kind: input, shape index: {}]   ;;  %s578_s5 = inlined_call_operand.vmem [shape: f32[32,128], index: 5, kind: input, shape index: {}]   ;;  %s579_s6 = inlined_call_operand.vmem [shape: f32[1,128], index: 6, kind: input, shape index: {}]   ;;  %s580_s7 = inlined_call_operand.hbm [shape: f32[16,128], index: 7, kind: output, shape index: {}]  }
   0x1   :  { %v476_v0 = vld [vmem:[%s573_s0] sm:$0xff] }
   0x2   :  { %12 = vsyncpa [#allocation3], 0  ;;  %29 = vadd.xlane.f32.xlu0 %v476_v0  ;;  %v482_v1 = vld [vmem:[%s573_s0 + $0x8] sm:$0xff]  ;;  %v70_v2 = vld [vmem:[%s576_s3] sm:$0xff]  ;;  %vm181_vm0 = vcmask 261120  }
   0x3   :  { %v71_v3 = vld [vmem:[%s576_s3 + $0x8] sm:$0xff]  ;;  %v72_v4 = vld [vmem:[%s576_s3 + $0x10] sm:$0xff]  ;;  %v73_v6 = vld [vmem:[%s576_s3 + $0x18] sm:$0xff] }
   0x4   :  { %v359_v5 = vpack.c.bf16 %v71_v3, %v70_v2  ;;  %v363_v7 = vpack.c.bf16 %v73_v6, %v72_v4  ;;  %v74_v16 = vld [vmem:[%s576_s3 + $0x20] sm:$0xff]  ;;  %v75_v17 = vld [vmem:[%s576_s3 + $0x28] sm:$0xff]  ;;  %v76_v19 = vld [vmem:[%s576_s3 + $0x30] sm:$0xff] }
   0x5   :  { %v367_v18 = vpack.c.bf16 %v75_v17, %v74_v16  ;;  %v77_v20 = vld [vmem:[%s576_s3 + $0x38] sm:$0xff]  ;;  %v78_v22 = vld [vmem:[%s576_s3 + $0x40] sm:$0xff]  ;;  %v79_v23 = vld [vmem:[%s576_s3 + $0x48] sm:$0xff] }
   0x6   :  { %31 = vadd.xlane.f32.xlu0 %v482_v1  ;;  %360 = vmatprep.subr.bf16.mxu0 %v359_v5  ;;  %v371_v21 = vpack.c.bf16 %v77_v20, %v76_v19  ;;  %v375_v24 = vpack.c.bf16 %v79_v23, %v78_v22  ;;  %v80_v25 = vld [vmem:[%s576_s3 + $0x50] sm:$0xff]  ;;  %v81_v26 = vld [vmem:[%s576_s3 + $0x58] sm:$0xff]  ;;  %v82_v27 = vld [vmem:[%s576_s3 + $0x60] sm:$0xff] }
   0x7   :  { %362 = vmatpush3.bf16.msra.mxu0 %v359_v5  ;;  %v379_v28 = vpack.c.bf16 %v81_v26, %v80_v25  ;;  %v83_v29 = vld [vmem:[%s576_s3 + $0x68] sm:$0xff]  ;;  %v84_v31 = vld [vmem:[%s576_s3 + $0x70] sm:$0xff]  ;;  %v85_v32 = vld [vmem:[%s576_s3 + $0x78] sm:$0xff] }
   0x8   :  { %364 = vmatprep.subr.bf16.mxu0 %v363_v7  ;;  %v383_v30 = vpack.c.bf16 %v83_v29, %v82_v27  ;;  %v387_v33 = vpack.c.bf16 %v85_v32, %v84_v31  ;;  %v170_v34 = vld [vmem:[%s578_s5] sm:$0xff]  ;;  %v171_v35 = vld [vmem:[%s578_s5 + $0x8] sm:$0xff]  ;;  %v172_v53 = vld [vmem:[%s578_s5 + $0x10] sm:$0xff] }
   0x9   :  { %v391_v36 = vpack.c.bf16 %v171_v35, %v170_v34  ;;  %v283_v44 = vld [vmem:[%s574_s1] ss:$0 sm:$0xff]  ;;  %v173_v54 = vld [vmem:[%s578_s5 + $0x18] sm:$0xff]  ;;  %s430_s5 = smov [#allocation2]  }
   0xa   :  { %v284_v46 = vld [vmem:[%s575_s2] ss:$0 sm:$0xff]  ;;  %v395_v55 = vpack.c.bf16 %v173_v54, %v172_v53  ;;  %s272_s25 = sshll.u32 %s430_s5, 4  ;;  %s273_s25 = int_to_ptr.vmem [resolvable:$true] %s272_s25 }
   0xb   :  { %366 = vmatpush3.bf16.msra.mxu0 %v363_v7  ;;  %392 = vmatprep.subr.bf16.mxu1 %v391_v36  ;;  %v285_v56 = vld [vmem:[%s577_s4] ss:$0 sm:$0xff]  ;;  %s406_s4 = scalar_lea.vmem %s273_s25, 256  ;;  %p411_p1 = scmp.lt.s32.totalorder %s273_s25, %s273_s25 }
   0xc   :  { %368 = vmatprep.subr.bf16.mxu0 %v367_v18  ;;  %394 = vmatpush3.bf16.msra.mxu1 %v391_v36  ;;  %v286_v63 = vld [vmem:[%s579_s6] ss:$0 sm:$0xff]  ;;  %p407_p0 = scmp.ne.s32.totalorder %s273_s25, %s406_s4  ;;  %p412_p2 = scmp.lt.s32.totalorder %s406_s4, %s406_s4 }
   0xd   :  { %396 = vmatprep.subr.bf16.mxu1 %v395_v55 }
   0xe   :  { %p413_p3 = por %p412_p2, %p411_p1 }
   0xf   :  { %370 = vmatpush3.bf16.msra.mxu0 %v367_v18 }
  0x10   :  { %372 = vmatprep.subr.bf16.mxu0 %v371_v21  ;;  %398 = vmatpush3.bf16.msra.mxu1 %v395_v55  ;;  %p414_p4 = pnand %p413_p3, %p407_p0 }
  0x13   :  { %374 = vmatpush3.bf16.msra.mxu0 %v371_v21 }
  0x14   :  { %376 = vmatprep.subr.bf16.mxu0 %v375_v24 }
  0x17   :  { %378 = vmatpush3.bf16.msra.mxu0 %v375_v24 }
  0x18   :  { %380 = vmatprep.subr.bf16.mxu0 %v379_v28 }
  0x1b   :  { %382 = vmatpush3.bf16.msra.mxu0 %v379_v28 }
  0x1c   :  { %384 = vmatprep.subr.bf16.mxu0 %v383_v30 }
  0x1f   :  { %386 = vmatpush3.bf16.msra.mxu0 %v383_v30 }
  0x20   :  { %388 = vmatprep.subr.bf16.mxu0 %v387_v33 }
  0x23   :  { %390 = vmatpush3.bf16.msra.mxu0 %v387_v33 }
  0x8f   :  { %v30_v8 = vpop.xlane.xlu0 %29 }
  0x90   :  { %v34_v9 = vmul.f32 0.0078125, %v30_v8 }
  0x92   :  { %v36_v10 = vsub.f32 %v476_v0, %v34_v9 }
  0x93   :  { %v32_v11 = vpop.xlane.xlu0 %31 }
  0x94   :  { %v35_v12 = vmul.f32 0.0078125, %v32_v11  ;;  %v38_v13 = vmul.f32 %v36_v10, %v36_v10 }
  0x96   :  { %v37_v14 = vsub.f32 %v482_v1, %v35_v12  ;;  %40 = vadd.xlane.f32.xlu1 %v38_v13 }
  0x98   :  { %v39_v15 = vmul.f32 %v37_v14, %v37_v14 }
  0x9a   :  { %42 = vadd.xlane.f32.xlu1 %v39_v15 }
 0x123   :  { %v41_v37 = vpop.xlane.xlu1 %40 }
 0x124   :  { %v44_v38 = vmul.f32 0.0078125, %v41_v37 }
 0x126   :  { %v46_v39 = vadd.f32 1e-05, %v44_v38 }
 0x127   :  { %v43_v40 = vpop.xlane.xlu1 %42 }
 0x128   :  { %402 = vrsqrt.f32 %v46_v39  ;;  %v45_v41 = vmul.f32 0.0078125, %v43_v40 }
 0x12a   :  { %v47_v42 = vadd.f32 1e-05, %v45_v41 }
 0x12c   :  { %404 = vrsqrt.f32 %v47_v42 }
 0x132   :  { %v403_v43 = vpop.eup %402 }
 0x133   :  { %v50_v45 = vmul.f32 %v403_v43, %v36_v10 }
 0x135   :  { %v59_v47 = vmul.f32 %v283_v44, %v50_v45 }
 0x136   :  { %v405_v48 = vpop.eup %404 }
 0x137   :  { %v51_v49 = vmul.f32 %v405_v48, %v37_v14  ;;  %v68_v50 = vadd.f32 %v284_v46, %v59_v47 }
 0x139   :  { %v60_v51 = vmul.f32 %v283_v44, %v51_v49  ;;  %345 = vmatprep.mubr.f32.mxu0 %v68_v50 }
 0x13b   :  { %v69_v52 = vadd.f32 %v284_v46, %v60_v51 }
 0x13d   :  { %346 = vmatmul.mubr.f32.vlgmr.msra.gmra.mrb[0].mxu0 %v69_v52 }
 0x210   :  { %v347_v57 = vpop.f32.mrb[0].mxu0 }
 0x211   :  { %v165_v58 = vadd.f32 %v347_v57, %v285_v56  ;;  %v159_v59 = vpop.f32.mrb[1].mxu0 }
 0x212   :  { %v160_v60 = vadd.f32 %v285_v56, %v159_v59 }
 0x213   :  { %v169_v62 = vmax.f32 %v165_v58, 0.0 }
 0x214   :  { %v168_v61 = vmax.f32 %v160_v60, 0.0 }
 0x216   :  { %356 = vmatprep.mubr.msk.f32.mxu1 %vm181_vm0, %v168_v61 }
 0x217   :  { %357 = vmatmul.mubr.msk.f32.vlgmr.msra.gmra.mrb[0].mxu1 %vm181_vm0, %v169_v62 }
 0x2ea   :  { %v358_v2 = vpop.f32.mrb[0].mxu1 }
 0x2eb   :  { %v260_v3 = vadd.f32 %v358_v2, %v286_v63  ;;  %v254_v4 = vpop.f32.mrb[1].mxu1 }
 0x2ec   :  { %v255_v5 = vadd.f32 %v286_v63, %v254_v4 }
 0x2ed   :  { %v264_v6 = vadd.f32 %v260_v3, %v482_v1 }
 0x2ee   :  { %v263_v7 = vadd.f32 %v255_v5, %v476_v0 }
 0x2ef   :  { %266 = vst [vmem:[#allocation2 + $0x8] sm:$0xff] %v264_v6 }
 0x2f0   :  { %265 = vst [vmem:[#allocation2] sm:$0xff] %v263_v7 }
 0x2f1   :  { %417 = shalt.err (!%p414_p4)
}
 0x2f2   :  { %s418_s27 = scalar_lea.hbm %s580_s7, 256 }
 0x2f3   :  { %p419_p5 = scmp.ne.s32.totalorder %s580_s7, %s418_s27  ;;  %p422_p6 = scmp.lt.u32.totalorder %s418_s27, %s580_s7 }
 0x2f5   :  { %p424_p7 = pnand %p422_p6, %p419_p5 }
 0x2f7   :  { %427 = shalt.err (!%p424_p7)
}
 0x2f8   :  { %s431_s9 = smov 128   ;;  %s432_s10 = smov 8  }
 0x2f9   :  { %278 = dma.vmem_to_hbm [thread:$0]  %s273_s25, 256, %s580_s7, [#allocation3], %s431_s9, %s431_s9, %s432_s10  }
 0x2fa   :  { %428 = dma.done.wait [#allocation3], 256  }
 0x2fb   :  { %429 = vsyncadd [#allocation3], 4294967040 }
 0x2fc   :  { %282 = vsyncpa [#allocation3], 1 }

</bundles_post_ra>
